<compile_context>
chip_gen: v5e
topology: v5e:2x2
jax: 0.10.0
libtpu: 0.0.40
codegen_flags: <defaults>
</compile_context>

<pallas_src>
import jax
import jax.numpy as jnp
from jax.experimental import pallas as pl
from jax.experimental.pallas import tpu as pltpu


def _margins(out_ref, y_ref):
    """Shared body: returns (one_hot, relu(logits - out_y + 1)) in f32."""
    logits = out_ref[...].astype(jnp.float32)        # (TB, C), cast in-kernel
    y = y_ref[...]                                   # (TB, 1) int32
    tb, c = logits.shape
    col = jax.lax.broadcasted_iota(jnp.int32, (tb, c), 1)
    one_hot = col == y                               # (TB, C) bool, lane-broadcast of y
    out_y = jnp.sum(jnp.where(one_hot, logits, 0.0), axis=1, keepdims=True)
    m = jnp.maximum(logits - out_y + 1.0, 0.0)       # relu margin, true class == 1.0
    return one_hot, m


def _hinge_mean_kernel(out_ref, y_ref, loss_ref):
    _, m = _margins(out_ref, y_ref)
    c = out_ref.shape[1]
    inv_c = jnp.float32(1.0 / c)                     # compile-time reciprocal
    # True-class column contributes exactly 1.0; remove it with the -1.0.
    row = (jnp.sum(m, axis=1, keepdims=True) - 1.0) * inv_c
    loss_ref[...] = row.astype(loss_ref.dtype)


def _hinge_none_kernel(out_ref, y_ref, loss_ref):
    one_hot, m = _margins(out_ref, y_ref)
    loss_ref[...] = jnp.where(one_hot, 0.0, m).astype(loss_ref.dtype)


def _pick_batch_tile(b, c, itemsize):
    """Batch tile: multiple of 8 rows, ~2 MiB of input per tile, >= 2 grid
    steps when the batch permits (v7x megacore + software pipelining)."""
    if b <= 8:
        return b                                     # block equals full batch dim
    target_bytes = 2 << 20                           # ~2 MiB input tile
    tb = target_bytes // max(1, c * itemsize)
    tb = max(8, (tb // 8) * 8)
    if tb >= b:
        # Whole batch fits one tile -> split in two so the grid isn't degenerate.
        tb = ((pl.cdiv(b, 2) + 7) // 8) * 8
    b_pad = ((b + 7) // 8) * 8
    return min(tb, b_pad)


def multi_class_hinge_loss(output, y, reduction="mean"):
    """Pallas TPU implementation of MultiClassHingeLoss.forward."""
    b, c = output.shape
    y2 = y.reshape(b, 1).astype(jnp.int32)

    out_dtype = (output.dtype
                 if jnp.issubdtype(output.dtype, jnp.floating) else jnp.float32)

    tb = _pick_batch_tile(b, c, jnp.dtype(output.dtype).itemsize)
    grid = (pl.cdiv(b, tb),)

    # Last two block dims are multiples of (8, 128) or equal the full array
    # dims, so the tiling is legal. Padded tail rows (when b % tb != 0) compute
    # garbage that the output BlockSpec drops on writeback.
    in_specs = [
        pl.BlockSpec((tb, c), lambda i: (i, 0)),
        pl.BlockSpec((tb, 1), lambda i: (i, 0)),
    ]
    cparams = pltpu.CompilerParams(dimension_semantics=("parallel",))

    if reduction == "mean":
        out = pl.pallas_call(
            _hinge_mean_kernel,
            out_shape=jax.ShapeDtypeStruct((b, 1), out_dtype),
            grid=grid,
            in_specs=in_specs,
            out_specs=pl.BlockSpec((tb, 1), lambda i: (i, 0)),
            compiler_params=cparams,
        )(output, y2)
        return out.reshape(b)
    else:
        out = pl.pallas_call(
            _hinge_none_kernel,
            out_shape=jax.ShapeDtypeStruct((b, c), out_dtype),
            grid=grid,
            in_specs=in_specs,
            out_specs=pl.BlockSpec((tb, c), lambda i: (i, 0)),
            compiler_params=cparams,
        )(output, y2)
        return out


def _reference(output, y, reduction="mean"):
    output = output.astype(jnp.float32)
    b, c = output.shape
    out_y = jnp.take_along_axis(output, y.reshape(b, 1), axis=1)
    loss = output - out_y + 1.0
    one_hot = jax.nn.one_hot(y, c, dtype=bool)
    loss = jnp.where(one_hot, 0.0, loss)
    loss = jnp.maximum(loss, 0.0)
    if reduction == "mean":
        return jnp.sum(loss, axis=1) / c
    return loss


if __name__ == "__main__":
    key = jax.random.PRNGKey(0)

    # --- small f32 case (matches module usage: batch=8, classes=16) ---
    B, C = 8, 16
    k_logits, k_labels, k2 = jax.random.split(key, 3)
    logits = jax.random.normal(k_logits, (B, C), dtype=jnp.float32)
    labels = jax.random.randint(k_labels, (B,), 0, C, dtype=jnp.int32)

    loss_mean = jax.block_until_ready(multi_class_hinge_loss(logits, labels, "mean"))
    loss_none = jax.block_until_ready(multi_class_hinge_loss(logits, labels, "none"))

    ref_mean = _reference(logits, labels, "mean")
    ref_none = _reference(logits, labels, "none")
    assert loss_mean.shape == (B,)
    assert loss_none.shape == (B, C)
    assert jnp.allclose(loss_mean, ref_mean, atol=1e-5, rtol=1e-5)
    assert jnp.allclose(loss_none, ref_none, atol=1e-5, rtol=1e-5)

    # --- multi-tile grid + bf16 in-kernel-cast path (B=32 -> 2 grid steps) ---
    B2, C2 = 32, 16
    k_l2, k_y2 = jax.random.split(k2)
    logits2 = jax.random.normal(k_l2, (B2, C2), dtype=jnp.bfloat16)
    labels2 = jax.random.randint(k_y2, (B2,), 0, C2, dtype=jnp.int32)

    lm2 = jax.block_until_ready(multi_class_hinge_loss(logits2, labels2, "mean"))
    ln2 = jax.block_until_ready(multi_class_hinge_loss(logits2, labels2, "none"))
    rm2 = _reference(logits2, labels2, "mean")
    rn2 = _reference(logits2, labels2, "none")
    assert lm2.shape == (B2,) and lm2.dtype == jnp.bfloat16
    assert ln2.shape == (B2, C2) and ln2.dtype == jnp.bfloat16
    assert jnp.allclose(lm2.astype(jnp.float32), rm2, atol=2e-2, rtol=2e-2)
    assert jnp.allclose(ln2.astype(jnp.float32), rn2, atol=2e-2, rtol=2e-2)

    # --- non-multiple-of-8 batch (partial last tile path) ---
    B3, C3 = 12, 10
    k_l3, k_y3 = jax.random.split(k_y2)
    logits3 = jax.random.normal(k_l3, (B3, C3), dtype=jnp.float32)
    labels3 = jax.random.randint(k_y3, (B3,), 0, C3, dtype=jnp.int32)
    lm3 = jax.block_until_ready(multi_class_hinge_loss(logits3, labels3, "mean"))
    assert jnp.allclose(lm3, _reference(logits3, labels3, "mean"), atol=1e-5, rtol=1e-5)

    print("KERNEL_OK")
</pallas_src>

<mosaic_0001>
module attributes {stable_mosaic.version = 11 : i64} {
  func.func @_hinge_mean_kernel(%arg0: i32, %arg1: memref<8x16xf32, #tpu.memory_space<vmem>>, %arg2: memref<8x1xi32, #tpu.memory_space<vmem>>, %arg3: memref<8x1xf32, #tpu.memory_space<vmem>>) attributes {dimension_semantics = [#tpu.dimension_semantics<parallel>], iteration_bounds = array<i64: 1>, scalar_prefetch = 0 : i64, scratch_operands = 0 : i64, tpu.core_type = #tpu.core_type<tc>, window_params = [{transform_indices = @transform_0, window_bounds = array<i64: 8, 16>}, {transform_indices = @transform_1, window_bounds = array<i64: 8, 1>}, {transform_indices = @transform_2, window_bounds = array<i64: 8, 1>}]} {
    %c0 = arith.constant 0 : index
    %c0_0 = arith.constant 0 : index
    %0 = vector.load %arg1[%c0, %c0_0] : memref<8x16xf32, #tpu.memory_space<vmem>>, vector<8x16xf32>
    %c0_1 = arith.constant 0 : index
    %c0_2 = arith.constant 0 : index
    %1 = vector.load %arg2[%c0_1, %c0_2] : memref<8x1xi32, #tpu.memory_space<vmem>>, vector<8x1xi32>
    %2 = tpu.iota {dimensions = array<i32: 1>} : vector<8x16xi32>
    %3 = vector.broadcast %1 : vector<8x1xi32> to vector<8x16xi32>
    %4 = arith.cmpi eq, %2, %3 : vector<8x16xi32>
    %cst = arith.constant 0.000000e+00 : f32
    %5 = vector.broadcast %cst : f32 to vector<8x16xf32>
    %6 = arith.select %4, %0, %5 : vector<8x16xi1>, vector<8x16xf32>
    %cst_3 = arith.constant dense<0.000000e+00> : vector<8xf32>
    %7 = vector.multi_reduction <add>, %6, %cst_3 [1] : vector<8x16xf32> to vector<8xf32>
    %8 = vector.shape_cast %7 : vector<8xf32> to vector<8x1xf32>
    %9 = vector.broadcast %8 : vector<8x1xf32> to vector<8x16xf32>
    %10 = arith.subf %0, %9 : vector<8x16xf32>
    %cst_4 = arith.constant 1.000000e+00 : f32
    %11 = vector.broadcast %cst_4 : f32 to vector<8x16xf32>
    %12 = arith.addf %10, %11 : vector<8x16xf32>
    %cst_5 = arith.constant 0.000000e+00 : f32
    %13 = vector.broadcast %cst_5 : f32 to vector<8x16xf32>
    %14 = arith.maximumf %12, %13 : vector<8x16xf32>
    %cst_6 = arith.constant dense<0.000000e+00> : vector<8xf32>
    %15 = vector.multi_reduction <add>, %14, %cst_6 [1] : vector<8x16xf32> to vector<8xf32>
    %16 = vector.shape_cast %15 : vector<8xf32> to vector<8x1xf32>
    %cst_7 = arith.constant 1.000000e+00 : f32
    %17 = vector.broadcast %cst_7 : f32 to vector<8x1xf32>
    %18 = arith.subf %16, %17 : vector<8x1xf32>
    %cst_8 = arith.constant 6.250000e-02 : f32
    %19 = vector.broadcast %cst_8 : f32 to vector<8x1xf32>
    %20 = arith.mulf %18, %19 : vector<8x1xf32>
    %c0_9 = arith.constant 0 : index
    %c0_10 = arith.constant 0 : index
    %21 = vector.load %arg3[%c0_9, %c0_10] : memref<8x1xf32, #tpu.memory_space<vmem>>, vector<8x1xf32>
    tpu.vector_store %arg3[%c0_9, %c0_10], %20 {strides = array<i32>} : memref<8x1xf32, #tpu.memory_space<vmem>>, vector<8x1xf32>,
    return
  }
  func.func @transform_0(%arg0: i32) -> (i32, i32) {
    %c0_i32 = arith.constant 0 : i32
    %c0_i32_0 = arith.constant 0 : i32
    return %arg0, %c0_i32 : i32, i32
  }
  func.func @transform_1(%arg0: i32) -> (i32, i32) {
    %c0_i32 = arith.constant 0 : i32
    %c0_i32_0 = arith.constant 0 : i32
    return %arg0, %c0_i32 : i32, i32
  }
  func.func @transform_2(%arg0: i32) -> (i32, i32) {
    %c0_i32 = arith.constant 0 : i32
    %c0_i32_0 = arith.constant 0 : i32
    return %arg0, %c0_i32 : i32, i32
  }
}

</mosaic_0001>

<bundles_post_ra>
// kernel: tpu_custom_call.1
= control target key start
LH: loop header
LB: loop body
LE: loop exit
PB: predicated region body
PF: predicated region fallthrough
CT: control target
= control target key end

     0   :  { %v41_v0 = vmov 0   ;;  %v13_v2 = vlaneseq  ;;  %vm20_vm0 = vcmask 130048   ;;  %vm32_vm2 = vcmask 7168   ;;  %s66_s1 = inlined_call_operand.vmem [shape: s32[8,1], index: 1, kind: input, shape index: {}]   ;;  %s67_s0 = inlined_call_operand.vmem [shape: f32[8,16], index: 0, kind: input, shape index: {}]   ;;  %s68_s2 = inlined_call_operand.vmem [shape: f32[8,1], index: 2, kind: output, shape index: {}]  }
   0x1   :  { %40 = vset.pattern.permute.xlu0 %v41_v0  ;;  %v12_v1 = vld [vmem:[%s66_s1] sm:$0xff] }
   0x2   :  { %16 = vperm.xlu0 %40, %v12_v1   ;;  %v14_v3 = vand.u32 127, %v13_v2  ;;  %v11_v4 = vld [vmem:[%s67_s0] sm:$0xff] }
  0x74   :  { %v17_v5 = vpop.permute.xlu0 %16 }
  0x75   :  { %vm18_vm1 = vcmp.eq.s32.totalorder %v14_v3, %v17_v5 }
  0x76   :  { %v19_v6 = vsel %vm18_vm1, %v11_v4, 0.0 }
  0x77   :  { %v21_v7 = vsel %vm20_vm0, %v19_v6, 0.0 }
  0x78   :  { %22 = vadd.xlane.f32.xlu0 %v21_v7 }
  0xeb   :  { %v23_v8 = vpop.xlane.xlu0 %22 }
  0xec   :  { %v24_v9 = vsub.f32 %v11_v4, %v23_v8 }
  0xee   :  { %v25_v10 = vadd.f32 1.0, %v24_v9 }
  0xf0   :  { %v26_v11 = vmax.f32 %v25_v10, 0.0 }
  0xf2   :  { %v27_v12 = vsel %vm20_vm0, %v26_v11, 0.0 }
  0xf3   :  { %28 = vadd.xlane.f32.xlu1 %v27_v12 }
 0x166   :  { %v29_v13 = vpop.xlane.xlu1 %28 }
 0x167   :  { %v38_v14 = vadd.f32 -1.0, %v29_v13 }
 0x169   :  { %v31_v15 = vmul.f32 0.0625, %v38_v14 }
 0x16b   :  { %33 = vst.msk [vmem:[%s68_s2] sm:$0xff] %vm32_vm2, %v31_v15 }

</bundles_post_ra>
